<compile_context>
chip_gen: v7x
topology: tpu7x:2x2x1
jax: 0.10.0
libtpu: 0.0.40
codegen_flags: <defaults>
</compile_context>

<pallas_src>
import math

import jax
import jax.numpy as jnp
from jax.experimental import pallas as pl
from jax.experimental.pallas import tpu as pltpu

LANE = 128  # TPU lane width: padded second-layer / output width.


# ------------------------------- kernel -------------------------------------

def _eva_mlp_kernel(x_ref, w1_ref, b1_ref, w2_ref, b2_ref, o_ref):
    """Fused MLP tile: o = relu(x @ w1 + b1) @ w2 + b2.

    x:(bm,K) f32   w1:(K,H) bf16   b1:(1,H) f32
    w2:(H,Np) bf16 (zero-padded to lane-dense Np=128)   b2:(1,Np) f32
    o:(bm,Np) f32
    Both matmuls hit the MXU in bf16 with f32 accumulation; the (bm,H)
    hidden activation only ever lives in vregs/VMEM (never written to HBM).
    """
    xb = x_ref[...].astype(jnp.bfloat16)
    h = jnp.dot(xb, w1_ref[...], preferred_element_type=jnp.float32)
    h = jnp.maximum(h + b1_ref[...], 0.0)
    y = jnp.dot(h.astype(jnp.bfloat16), w2_ref[...],
                preferred_element_type=jnp.float32)
    o_ref[...] = (y + b2_ref[...]).astype(o_ref.dtype)


# ------------------------------ wrapper -------------------------------------

def eva_classifier_forward(x, params, *, block_m=512):
    """x: (M, input_size) float32 -> logits (M, output_size) float32."""
    m, k = x.shape
    w1, b1, w2, b2 = params["w1"], params["b1"], params["w2"], params["b2"]
    h = w1.shape[1]
    n = w2.shape[1]

    # Lane-dense second layer: zero-pad the tiny (H, n) / (1, n) tensors.
    n_pad = max(LANE, ((n + LANE - 1) // LANE) * LANE)
    w2p = jnp.pad(w2, ((0, 0), (0, n_pad - n)))
    b2p = jnp.pad(b2, ((0, 0), (0, n_pad - n)))

    out_shape = jax.ShapeDtypeStruct((m, n_pad), jnp.float32)

    cost = pl.CostEstimate(
        flops=2 * m * k * h + 2 * m * h * n_pad,
        transcendentals=0,
        bytes_accessed=(m * k * x.dtype.itemsize
                        + k * h * w1.dtype.itemsize
                        + h * b1.dtype.itemsize
                        + h * n_pad * w2p.dtype.itemsize
                        + n_pad * b2p.dtype.itemsize
                        + m * n_pad * 4),
    )
    cparams_kwargs = dict(vmem_limit_bytes=32 * 1024 * 1024)

    if m > block_m:
        # Row-blocked grid: always >= 2 blocks on this path (v7x can shard the
        # "parallel" axis across its 2 TensorCores); pl.cdiv handles a ragged
        # last block so any batch size works. Weights/biases have constant
        # index_maps and stay resident across grid steps.
        grid = (pl.cdiv(m, block_m),)
        out = pl.pallas_call(
            _eva_mlp_kernel,
            grid=grid,
            in_specs=[
                pl.BlockSpec((block_m, k), lambda i: (i, 0)),
                pl.BlockSpec((k, h), lambda i: (0, 0)),
                pl.BlockSpec((1, h), lambda i: (0, 0)),
                pl.BlockSpec((h, n_pad), lambda i: (0, 0)),
                pl.BlockSpec((1, n_pad), lambda i: (0, 0)),
            ],
            out_specs=pl.BlockSpec((block_m, n_pad), lambda i: (i, 0)),
            out_shape=out_shape,
            compiler_params=pltpu.CompilerParams(
                dimension_semantics=("parallel",), **cparams_kwargs),
            cost_estimate=cost,
        )(x, w1, b1, w2p, b2p)
    else:
        # Small batch: single grid-less call, whole problem resident in VMEM,
        # no per-step pipeline overhead.
        out = pl.pallas_call(
            _eva_mlp_kernel,
            out_shape=out_shape,
            compiler_params=pltpu.CompilerParams(**cparams_kwargs),
            cost_estimate=cost,
        )(x, w1, b1, w2p, b2p)

    return out[:, :n]


# ----------------------------- parameters -----------------------------------

def init_params(key, *, input_size=1024, nn_size=512, output_size=2):
    """PyTorch-Linear-like uniform fan-in init. Weights kept in bf16."""
    k1, k2, k3, k4 = jax.random.split(key, 4)

    def uni(k, shape, fan_in, dtype=jnp.float32):
        bound = 1.0 / math.sqrt(fan_in)
        return jax.random.uniform(k, shape, jnp.float32, -bound, bound).astype(dtype)

    return {
        "w1": uni(k1, (input_size, nn_size), input_size, jnp.bfloat16),
        "b1": uni(k2, (1, nn_size), input_size),
        "w2": uni(k3, (nn_size, output_size), nn_size, jnp.bfloat16),
        "b2": uni(k4, (1, output_size), nn_size),
    }


# -------------------------------- main --------------------------------------

if __name__ == "__main__":
    key = jax.random.PRNGKey(0)
    pkey, xkey = jax.random.split(key)

    B, INPUT, HIDDEN, OUT = 8, 1024, 512, 2   # module defaults, small batch
    params = init_params(pkey, input_size=INPUT, nn_size=HIDDEN, output_size=OUT)
    x = jax.random.normal(xkey, (B, INPUT), jnp.float32)

    fwd = jax.jit(eva_classifier_forward)

    def ref_fwd(xv, p):  # same math / same bf16 weight quantization, plain JAX
        hh = jnp.dot(xv.astype(jnp.bfloat16), p["w1"],
                     preferred_element_type=jnp.float32) + p["b1"]
        hh = jnp.maximum(hh, 0.0)
        return jnp.dot(hh.astype(jnp.bfloat16), p["w2"],
                       preferred_element_type=jnp.float32) + p["b2"]

    # Small-batch (grid-less) path.
    logits = fwd(x, params)
    jax.block_until_ready(logits)
    assert logits.shape == (B, OUT) and logits.dtype == jnp.float32
    assert jnp.allclose(logits, ref_fwd(x, params), atol=2e-2, rtol=2e-2)

    # Row-blocked grid path (>= 2 row blocks, ragged last block).
    xg = jax.random.normal(xkey, (1100, INPUT), jnp.float32)
    logits_g = fwd(xg, params)
    jax.block_until_ready(logits_g)
    assert logits_g.shape == (1100, OUT) and logits_g.dtype == jnp.float32
    assert jnp.allclose(logits_g, ref_fwd(xg, params), atol=2e-2, rtol=2e-2)

    print("KERNEL_OK")
</pallas_src>

<mosaic_0001>
module attributes {stable_mosaic.version = 11 : i64} {
  func.func @_eva_mlp_kernel(%arg0: memref<8x1024xf32, #tpu.memory_space<vmem>>, %arg1: memref<1024x512xbf16, #tpu.memory_space<vmem>>, %arg2: memref<1x512xf32, #tpu.memory_space<vmem>>, %arg3: memref<512x128xbf16, #tpu.memory_space<vmem>>, %arg4: memref<1x128xf32, #tpu.memory_space<vmem>>, %arg5: memref<8x128xf32, #tpu.memory_space<vmem>>) attributes {dimension_semantics = [], scalar_prefetch = 0 : i64, scratch_operands = 0 : i64, tpu.core_type = #tpu.core_type<tc>} {
    %c0 = arith.constant 0 : index
    %c0_0 = arith.constant 0 : index
    %0 = vector.load %arg0[%c0, %c0_0] : memref<8x1024xf32, #tpu.memory_space<vmem>>, vector<8x1024xf32>
    %1 = arith.truncf %0 : vector<8x1024xf32> to vector<8x1024xbf16>
    %c0_1 = arith.constant 0 : index
    %c0_2 = arith.constant 0 : index
    %2 = vector.load %arg1[%c0_1, %c0_2] : memref<1024x512xbf16, #tpu.memory_space<vmem>>, vector<1024x512xbf16>
    %cst = arith.constant dense<0.000000e+00> : vector<8x512xf32>
    %3 = tpu.matmul %1, %2, %cst {dimension_numbers = #tpu.dot_dimension_numbers<[1], [0], [0], [1], [0, 0, 1, 1], [], []>} : vector<8x1024xbf16>, vector<1024x512xbf16>, vector<8x512xf32> -> vector<8x512xf32>
    %c0_3 = arith.constant 0 : index
    %c0_4 = arith.constant 0 : index
    %4 = vector.load %arg2[%c0_3, %c0_4] : memref<1x512xf32, #tpu.memory_space<vmem>>, vector<1x512xf32>
    %5 = vector.broadcast %4 : vector<1x512xf32> to vector<8x512xf32>
    %6 = arith.addf %3, %5 : vector<8x512xf32>
    %cst_5 = arith.constant 0.000000e+00 : f32
    %7 = vector.broadcast %cst_5 : f32 to vector<8x512xf32>
    %8 = arith.maximumf %6, %7 : vector<8x512xf32>
    %9 = arith.truncf %8 : vector<8x512xf32> to vector<8x512xbf16>
    %c0_6 = arith.constant 0 : index
    %c0_7 = arith.constant 0 : index
    %10 = vector.load %arg3[%c0_6, %c0_7] : memref<512x128xbf16, #tpu.memory_space<vmem>>, vector<512x128xbf16>
    %cst_8 = arith.constant dense<0.000000e+00> : vector<8x128xf32>
    %11 = tpu.matmul %9, %10, %cst_8 {dimension_numbers = #tpu.dot_dimension_numbers<[1], [0], [0], [1], [0, 0, 1, 1], [], []>} : vector<8x512xbf16>, vector<512x128xbf16>, vector<8x128xf32> -> vector<8x128xf32>
    %c0_9 = arith.constant 0 : index
    %c0_10 = arith.constant 0 : index
    %12 = vector.load %arg4[%c0_9, %c0_10] : memref<1x128xf32, #tpu.memory_space<vmem>>, vector<1x128xf32>
    %13 = vector.broadcast %12 : vector<1x128xf32> to vector<8x128xf32>
    %14 = arith.addf %11, %13 : vector<8x128xf32>
    %c0_11 = arith.constant 0 : index
    %c0_12 = arith.constant 0 : index
    %15 = vector.load %arg5[%c0_11, %c0_12] : memref<8x128xf32, #tpu.memory_space<vmem>>, vector<8x128xf32>
    tpu.vector_store %arg5[%c0_11, %c0_12], %14 {strides = array<i32>} : memref<8x128xf32, #tpu.memory_space<vmem>>, vector<8x128xf32>,
    return
  }
}

</mosaic_0001>

<bundles_post_ra>
// kernel: eva_classifier_forward.1
= control target key start
LH: loop header
LB: loop body
LE: loop exit
PB: predicated region body
PF: predicated region fallthrough
CT: control target
= control target key end

     0   :  { %10 = vsyncpa [#allocation3], 0  ;;  %s3098_s18 = smov [#allocation2]   ;;  %s3272_s0 = inlined_call_operand.vmem [shape: f32[8,1024], index: 0, kind: input, shape index: {}]   ;;  %s3273_s1 = inlined_call_operand.hbm [shape: bf16[1024,512], index: 1, kind: input, shape index: {}]   ;;  %s3274_s2 = inlined_call_operand.vmem [shape: f32[1,512], index: 2, kind: input, shape index: {}]   ;;  %s3275_s3 = inlined_call_operand.vmem [shape: bf16[512,128], index: 3, kind: input, shape index: {}]   ;;  %s3276_s4 = inlined_call_operand.vmem [shape: f32[1,128], index: 4, kind: input, shape index: {}]   ;;  %s3277_s5 = inlined_call_operand.vmem [shape: f32[8,128], index: 5, kind: output, shape index: {}]  }
   0x1   :  { %s18_s19 = sshll.u32 %s3098_s18, 4  ;;  %s3074_s22 = scalar_lea.hbm %s3273_s1, 32768  ;;  %s19_s19 = int_to_ptr.vmem [resolvable:$true] %s18_s19 }
   0x2   :  { %p3075_p0 = scmp.ne.s32.totalorder %s3273_s1, %s3074_s22  ;;  %p3078_p1 = scmp.lt.u32.totalorder %s3074_s22, %s3273_s1 }
   0x4   :  { %p3080_p2 = pnand %p3078_p1, %p3075_p0 }
   0x6   :  { %3083 = shalt.err (!%p3080_p2)
}
   0x7   :  { %s3084_s27 = scalar_lea.vmem %s19_s19, 32768  ;;  %p3089_p4 = scmp.lt.s32.totalorder %s19_s19, %s19_s19 }
   0x8   :  { %p3085_p3 = scmp.ne.s32.totalorder %s19_s19, %s3084_s27  ;;  %p3090_p5 = scmp.lt.s32.totalorder %s3084_s27, %s3084_s27 }
   0xa   :  { %p3091_p6 = por %p3090_p5, %p3089_p4 }
   0xc   :  { %p3092_p7 = pnand %p3091_p6, %p3085_p3 }
   0xe   :  { %3095 = shalt.err (!%p3092_p7)
}
   0xf   :  { %s3099_s28 = smov 256   ;;  %s3100_s29 = smov 16  }
  0x10   :  { %24 = dma.hbm_to_vmem [thread:$0]  %s3273_s1, 32768, %s19_s19, [#allocation3], %s3099_s28, %s3099_s28, %s3100_s29  }
  0x11   :  { %3096 = dma.done.wait [#allocation3], 32768  }
  0x12   :  { %3097 = vsyncadd [#allocation3], 4294934528  ;;  %v2658_v0 = vld [vmem:[#allocation2 + $0x4] ss:$16 sps:$4 sm:$0xff]   ;;  %v2660_v1 = vld [vmem:[#allocation2 + $0xc] ss:$16 sps:$4 sm:$0xff]  }
  0x13   :  { %1609 = vmatprep.subr.bf16.mxu0 %v2658_v0  ;;  %v2662_v2 = vld [vmem:[#allocation2] ss:$16 sps:$4 sm:$0xff]   ;;  %v2663_v3 = vld [vmem:[#allocation2 + $0x8] ss:$16 sps:$4 sm:$0xff]   ;;  %1773 = vmatprep.subr.bf16.mxu1 %v2660_v1  ;;  %v2664_v4 = vld [vmem:[#allocation2 + $0x24] ss:$16 sps:$4 sm:$0xff]  }
  0x14   :  { %1610 = vmatpush1.bf16.msra.mxu0 %v2662_v2  ;;  %1774 = vmatpush1.bf16.msra.mxu1 %v2663_v3  ;;  %v2666_v5 = vld [vmem:[#allocation2 + $0x2c] ss:$16 sps:$4 sm:$0xff]   ;;  %v2668_v6 = vld [vmem:[#allocation2 + $0x20] ss:$16 sps:$4 sm:$0xff]   ;;  %v2669_v7 = vld [vmem:[#allocation2 + $0x28] ss:$16 sps:$4 sm:$0xff]  }
  0x15   :  { %1611 = vmatprep.subr.bf16.mxu0 %v2664_v4  ;;  %1775 = vmatprep.subr.bf16.mxu1 %v2666_v5  ;;  %v2670_v8 = vld [vmem:[#allocation2 + $0x44] ss:$16 sps:$4 sm:$0xff]   ;;  %v2672_v9 = vld [vmem:[#allocation2 + $0x4c] ss:$16 sps:$4 sm:$0xff]   ;;  %v2674_v10 = vld [vmem:[#allocation2 + $0x40] ss:$16 sps:$4 sm:$0xff]  }
  0x16   :  { %v2675_v11 = vld [vmem:[#allocation2 + $0x48] ss:$16 sps:$4 sm:$0xff]   ;;  %v2676_v12 = vld [vmem:[#allocation2 + $0x64] ss:$16 sps:$4 sm:$0xff]   ;;  %v2678_v13 = vld [vmem:[#allocation2 + $0x6c] ss:$16 sps:$4 sm:$0xff]  }
  0x17   :  { %v2680_v14 = vld [vmem:[#allocation2 + $0x60] ss:$16 sps:$4 sm:$0xff]   ;;  %v2681_v15 = vld [vmem:[#allocation2 + $0x68] ss:$16 sps:$4 sm:$0xff]   ;;  %v2682_v16 = vld [vmem:[#allocation2 + $0x84] ss:$16 sps:$4 sm:$0xff]  }
  0x18   :  { %1612 = vmatpush1.bf16.msra.mxu0 %v2668_v6  ;;  %1776 = vmatpush1.bf16.msra.mxu1 %v2669_v7  ;;  %v2684_v17 = vld [vmem:[#allocation2 + $0x8c] ss:$16 sps:$4 sm:$0xff]   ;;  %v2686_v18 = vld [vmem:[#allocation2 + $0x80] ss:$16 sps:$4 sm:$0xff]   ;;  %v2687_v19 = vld [vmem:[#allocation2 + $0x88] ss:$16 sps:$4 sm:$0xff]  }
  0x19   :  { %1613 = vmatprep.subr.bf16.mxu0 %v2670_v8  ;;  %1777 = vmatprep.subr.bf16.mxu1 %v2672_v9  ;;  %v2688_v20 = vld [vmem:[#allocation2 + $0xa4] ss:$16 sps:$4 sm:$0xff]   ;;  %v2690_v21 = vld [vmem:[#allocation2 + $0xac] ss:$16 sps:$4 sm:$0xff]   ;;  %v2692_v22 = vld [vmem:[#allocation2 + $0xa0] ss:$16 sps:$4 sm:$0xff]  }
  0x1a   :  { %v2693_v23 = vld [vmem:[#allocation2 + $0xa8] ss:$16 sps:$4 sm:$0xff]   ;;  %v2694_v24 = vld [vmem:[#allocation2 + $0xc4] ss:$16 sps:$4 sm:$0xff]   ;;  %v2696_v25 = vld [vmem:[#allocation2 + $0xcc] ss:$16 sps:$4 sm:$0xff]  }
  0x1b   :  { %v2698_v26 = vld [vmem:[#allocation2 + $0xc0] ss:$16 sps:$4 sm:$0xff]   ;;  %v2699_v27 = vld [vmem:[#allocation2 + $0xc8] ss:$16 sps:$4 sm:$0xff]   ;;  %v2700_v28 = vld [vmem:[#allocation2 + $0xe4] ss:$16 sps:$4 sm:$0xff]  }
  0x1c   :  { %1614 = vmatpush1.bf16.msra.mxu0 %v2674_v10  ;;  %1778 = vmatpush1.bf16.msra.mxu1 %v2675_v11  ;;  %v2702_v29 = vld [vmem:[#allocation2 + $0xec] ss:$16 sps:$4 sm:$0xff]   ;;  %v2704_v30 = vld [vmem:[#allocation2 + $0xe0] ss:$16 sps:$4 sm:$0xff]   ;;  %v2705_v31 = vld [vmem:[#allocation2 + $0xe8] ss:$16 sps:$4 sm:$0xff]  }
  0x1d   :  { %1615 = vmatprep.subr.bf16.mxu0 %v2676_v12  ;;  %1779 = vmatprep.subr.bf16.mxu1 %v2678_v13  ;;  %v2706_v32 = vld [vmem:[#allocation2 + $0x104] ss:$16 sps:$4 sm:$0xff]   ;;  %v2708_v33 = vld [vmem:[#allocation2 + $0x10c] ss:$16 sps:$4 sm:$0xff]   ;;  %v2710_v34 = vld [vmem:[#allocation2 + $0x100] ss:$16 sps:$4 sm:$0xff]  }
  0x1e   :  { %v2711_v35 = vld [vmem:[#allocation2 + $0x108] ss:$16 sps:$4 sm:$0xff]   ;;  %v2712_v36 = vld [vmem:[#allocation2 + $0x124] ss:$16 sps:$4 sm:$0xff]   ;;  %v2714_v37 = vld [vmem:[#allocation2 + $0x12c] ss:$16 sps:$4 sm:$0xff]  }
  0x1f   :  { %v2716_v38 = vld [vmem:[#allocation2 + $0x120] ss:$16 sps:$4 sm:$0xff]   ;;  %v2717_v39 = vld [vmem:[#allocation2 + $0x128] ss:$16 sps:$4 sm:$0xff]   ;;  %v2718_v40 = vld [vmem:[#allocation2 + $0x144] ss:$16 sps:$4 sm:$0xff]  }
  0x20   :  { %1616 = vmatpush1.bf16.msra.mxu0 %v2680_v14  ;;  %1780 = vmatpush1.bf16.msra.mxu1 %v2681_v15  ;;  %v2720_v41 = vld [vmem:[#allocation2 + $0x14c] ss:$16 sps:$4 sm:$0xff]   ;;  %v2722_v42 = vld [vmem:[#allocation2 + $0x140] ss:$16 sps:$4 sm:$0xff]   ;;  %v2723_v43 = vld [vmem:[#allocation2 + $0x148] ss:$16 sps:$4 sm:$0xff]  }
  0x21   :  { %1617 = vmatprep.subr.bf16.mxu0 %v2682_v16  ;;  %1781 = vmatprep.subr.bf16.mxu1 %v2684_v17  ;;  %v2724_v44 = vld [vmem:[#allocation2 + $0x164] ss:$16 sps:$4 sm:$0xff]   ;;  %v2726_v45 = vld [vmem:[#allocation2 + $0x16c] ss:$16 sps:$4 sm:$0xff]   ;;  %v2728_v47 = vld [vmem:[#allocation2 + $0x160] ss:$16 sps:$4 sm:$0xff]  }
  0x22   :  { %v36_v46 = vld [vmem:[%s3272_s0 + $0x8] sm:$0xff]  ;;  %v2730_v50 = vld [vmem:[#allocation2 + $0x184] ss:$16 sps:$4 sm:$0xff]   ;;  %v2734_v52 = vld [vmem:[#allocation2 + $0x180] ss:$16 sps:$4 sm:$0xff]  }
  0x23   :  { %v44_v48 = vpack.c.bf16 %v36_v46, %v36_v46  ;;  %v2729_v49 = vld [vmem:[#allocation2 + $0x168] ss:$16 sps:$4 sm:$0xff]   ;;  %v2732_v51 = vld [vmem:[#allocation2 + $0x18c] ss:$16 sps:$4 sm:$0xff]   ;;  %v2736_v54 = vld [vmem:[#allocation2 + $0x1a4] ss:$16 sps:$4 sm:$0xff]  }
  0x24   :  { %1618 = vmatpush1.bf16.msra.mxu0 %v2686_v18  ;;  %1782 = vmatpush1.bf16.msra.mxu1 %v2687_v19  ;;  %v2735_v53 = vld [vmem:[#allocation2 + $0x188] ss:$16 sps:$4 sm:$0xff]   ;;  %v2738_v55 = vld [vmem:[#allocation2 + $0x1ac] ss:$16 sps:$4 sm:$0xff]   ;;  %v2740_v56 = vld [vmem:[#allocation2 + $0x1a0] ss:$16 sps:$4 sm:$0xff]  }
  0x25   :  { %1619 = vmatprep.subr.bf16.mxu0 %v2688_v20  ;;  %1783 = vmatprep.subr.bf16.mxu1 %v2690_v21  ;;  %v2741_v57 = vld [vmem:[#allocation2 + $0x1a8] ss:$16 sps:$4 sm:$0xff]   ;;  %v2742_v58 = vld [vmem:[#allocation2 + $0x1c4] ss:$16 sps:$4 sm:$0xff]   ;;  %v2744_v59 = vld [vmem:[#allocation2 + $0x1cc] ss:$16 sps:$4 sm:$0xff]  }
  0x26   :  { %1641 = vmatprep.mubr.bf16.mxu0 %v44_v48  ;;  %1805 = vmatprep.mubr.bf16.mxu1 %v44_v48  ;;  %v2746_v60 = vld [vmem:[#allocation2 + $0x1c0] ss:$16 sps:$4 sm:$0xff]   ;;  %v2747_v61 = vld [vmem:[#allocation2 + $0x1c8] ss:$16 sps:$4 sm:$0xff]   ;;  %v2748_v62 = vld [vmem:[#allocation2 + $0x1e4] ss:$16 sps:$4 sm:$0xff]  }
  0x27   :  { %v2750_v63 = vld [vmem:[#allocation2 + $0x1ec] ss:$16 sps:$4 sm:$0xff]   ;;  %v2752_v0 = vld [vmem:[#allocation2 + $0x1e0] ss:$16 sps:$4 sm:$0xff]   ;;  %v2753_v1 = vld [vmem:[#allocation2 + $0x1e8] ss:$16 sps:$4 sm:$0xff]  }
  0x28   :  { %1620 = vmatpush1.bf16.msra.mxu0 %v2692_v22  ;;  %1784 = vmatpush1.bf16.msra.mxu1 %v2693_v23  ;;  %v35_v2 = vld [vmem:[%s3272_s0] sm:$0xff]  ;;  %v2759_v4 = vld [vmem:[#allocation2 + $0x20c] ss:$16 sps:$4 sm:$0xff]   ;;  %v2757_v7 = vld [vmem:[#allocation2 + $0x208] ss:$16 sps:$4 sm:$0xff]  }
  0x29   :  { %1621 = vmatprep.subr.bf16.mxu0 %v2694_v24  ;;  %1785 = vmatprep.subr.bf16.mxu1 %v2696_v25  ;;  %v2756_v3 = vld [vmem:[#allocation2 + $0x204] ss:$16 sps:$4 sm:$0xff]   ;;  %v43_v5 = vpack.c.bf16 %v35_v2, %v35_v2  ;;  %v2754_v6 = vld [vmem:[#allocation2 + $0x200] ss:$16 sps:$4 sm:$0xff]   ;;  %v2765_v9 = vld [vmem:[#allocation2 + $0x22c] ss:$16 sps:$4 sm:$0xff]  }
  0x2a   :  { %v2762_v8 = vld [vmem:[#allocation2 + $0x224] ss:$16 sps:$4 sm:$0xff]   ;;  %v2760_v10 = vld [vmem:[#allocation2 + $0x220] ss:$16 sps:$4 sm:$0xff]   ;;  %v2763_v11 = vld [vmem:[#allocation2 + $0x228] ss:$16 sps:$4 sm:$0xff]  }
  0x2b   :  { %v2768_v12 = vld [vmem:[#allocation2 + $0x244] ss:$16 sps:$4 sm:$0xff]   ;;  %v2771_v13 = vld [vmem:[#allocation2 + $0x24c] ss:$16 sps:$4 sm:$0xff]   ;;  %v2766_v14 = vld [vmem:[#allocation2 + $0x240] ss:$16 sps:$4 sm:$0xff]  }
  0x2c   :  { %1622 = vmatpush1.bf16.msra.mxu0 %v2698_v26  ;;  %1786 = vmatpush1.bf16.msra.mxu1 %v2699_v27  ;;  %v2769_v15 = vld [vmem:[#allocation2 + $0x248] ss:$16 sps:$4 sm:$0xff]   ;;  %v2774_v16 = vld [vmem:[#allocation2 + $0x264] ss:$16 sps:$4 sm:$0xff]   ;;  %v2777_v17 = vld [vmem:[#allocation2 + $0x26c] ss:$16 sps:$4 sm:$0xff]  }
  0x2d   :  { %1623 = vmatprep.subr.bf16.mxu0 %v2700_v28  ;;  %1787 = vmatprep.subr.bf16.mxu1 %v2702_v29  ;;  %v2772_v18 = vld [vmem:[#allocation2 + $0x260] ss:$16 sps:$4 sm:$0xff]   ;;  %v2775_v19 = vld [vmem:[#allocation2 + $0x268] ss:$16 sps:$4 sm:$0xff]   ;;  %v2780_v20 = vld [vmem:[#allocation2 + $0x284] ss:$16 sps:$4 sm:$0xff]  }
  0x2e   :  { %v2783_v21 = vld [vmem:[#allocation2 + $0x28c] ss:$16 sps:$4 sm:$0xff]   ;;  %v2778_v22 = vld [vmem:[#allocation2 + $0x280] ss:$16 sps:$4 sm:$0xff]   ;;  %v2781_v23 = vld [vmem:[#allocation2 + $0x288] ss:$16 sps:$4 sm:$0xff]  }
  0x2f   :  { %v2786_v24 = vld [vmem:[#allocation2 + $0x2a4] ss:$16 sps:$4 sm:$0xff]   ;;  %v2789_v25 = vld [vmem:[#allocation2 + $0x2ac] ss:$16 sps:$4 sm:$0xff]   ;;  %v2784_v26 = vld [vmem:[#allocation2 + $0x2a0] ss:$16 sps:$4 sm:$0xff]  }
  0x30   :  { %1624 = vmatpush1.bf16.msra.mxu0 %v2704_v30  ;;  %1788 = vmatpush1.bf16.msra.mxu1 %v2705_v31  ;;  %v2787_v27 = vld [vmem:[#allocation2 + $0x2a8] ss:$16 sps:$4 sm:$0xff]   ;;  %v2792_v28 = vld [vmem:[#allocation2 + $0x2c4] ss:$16 sps:$4 sm:$0xff]   ;;  %v2795_v29 = vld [vmem:[#allocation2 + $0x2cc] ss:$16 sps:$4 sm:$0xff]  }
  0x31   :  { %1625 = vmatprep.subr.bf16.mxu0 %v2706_v32  ;;  %1789 = vmatprep.subr.bf16.mxu1 %v2708_v33  ;;  %v38_v30 = vld [vmem:[%s3272_s0 + $0x18] sm:$0xff]  ;;  %v2790_v31 = vld [vmem:[#allocation2 + $0x2c0] ss:$16 sps:$4 sm:$0xff]   ;;  %v2816_v46 = vld [vmem:[#allocation2 + $0x344] ss:$16 sps:$4 sm:$0xff]  }
  0x32   :  { %v46_v32 = vpack.c.bf16 %v38_v30, %v38_v30  ;;  %v2793_v33 = vld [vmem:[#allocation2 + $0x2c8] ss:$16 sps:$4 sm:$0xff]   ;;  %v2814_v48 = vld [vmem:[#allocation2 + $0x340] ss:$16 sps:$4 sm:$0xff]   ;;  %v2846_v2 = vld [vmem:[#allocation2 + $0x3e4] ss:$16 sps:$4 sm:$0xff]  }
  0x33   :  { %v2882_v30 = vld [vmem:[#allocation2 + $0x4a4] ss:$16 sps:$4 sm:$0xff]  }
  0x34   :  { %1626 = vmatpush1.bf16.msra.mxu0 %v2710_v34  ;;  %1790 = vmatpush1.bf16.msra.mxu1 %v2711_v35  ;;  %v2798_v34 = vld [vmem:[#allocation2 + $0x2e4] ss:$16 sps:$4 sm:$0xff]   ;;  %v2801_v35 = vld [vmem:[#allocation2 + $0x2ec] ss:$16 sps:$4 sm:$0xff]  }
  0x35   :  { %1627 = vmatprep.subr.bf16.mxu0 %v2712_v36  ;;  %1791 = vmatprep.subr.bf16.mxu1 %v2714_v37  ;;  %v2796_v36 = vld [vmem:[#allocation2 + $0x2e0] ss:$16 sps:$4 sm:$0xff]   ;;  %v2799_v37 = vld [vmem:[#allocation2 + $0x2e8] ss:$16 sps:$4 sm:$0xff]  }
  0x38   :  { %1628 = vmatpush1.bf16.msra.mxu0 %v2716_v38  ;;  %1792 = vmatpush1.bf16.msra.mxu1 %v2717_v39  ;;  %v2804_v38 = vld [vmem:[#allocation2 + $0x304] ss:$16 sps:$4 sm:$0xff]   ;;  %v2807_v39 = vld [vmem:[#allocation2 + $0x30c] ss:$16 sps:$4 sm:$0xff]  }
  0x39   :  { %1629 = vmatprep.subr.bf16.mxu0 %v2718_v40  ;;  %1793 = vmatprep.subr.bf16.mxu1 %v2720_v41  ;;  %v2802_v40 = vld [vmem:[#allocation2 + $0x300] ss:$16 sps:$4 sm:$0xff]   ;;  %v2805_v41 = vld [vmem:[#allocation2 + $0x308] ss:$16 sps:$4 sm:$0xff]  }
  0x3c   :  { %1630 = vmatpush1.bf16.msra.mxu0 %v2722_v42  ;;  %1794 = vmatpush1.bf16.msra.mxu1 %v2723_v43  ;;  %v2810_v42 = vld [vmem:[#allocation2 + $0x324] ss:$16 sps:$4 sm:$0xff]   ;;  %v2813_v43 = vld [vmem:[#allocation2 + $0x32c] ss:$16 sps:$4 sm:$0xff]  }
  0x3d   :  { %1631 = vmatprep.subr.bf16.mxu0 %v2724_v44  ;;  %1795 = vmatprep.subr.bf16.mxu1 %v2726_v45  ;;  %v2808_v44 = vld [vmem:[#allocation2 + $0x320] ss:$16 sps:$4 sm:$0xff]   ;;  %v2811_v45 = vld [vmem:[#allocation2 + $0x328] ss:$16 sps:$4 sm:$0xff]  }
  0x40   :  { %1632 = vmatpush1.bf16.msra.mxu0 %v2728_v47  ;;  %1796 = vmatpush1.bf16.msra.mxu1 %v2729_v49  ;;  %v2819_v47 = vld [vmem:[#allocation2 + $0x34c] ss:$16 sps:$4 sm:$0xff]   ;;  %v2817_v49 = vld [vmem:[#allocation2 + $0x348] ss:$16 sps:$4 sm:$0xff]  }
  0x41   :  { %1633 = vmatprep.subr.bf16.mxu0 %v2730_v50  ;;  %1797 = vmatprep.subr.bf16.mxu1 %v2732_v51  ;;  %v2822_v50 = vld [vmem:[#allocation2 + $0x364] ss:$16 sps:$4 sm:$0xff]   ;;  %v2825_v51 = vld [vmem:[#allocation2 + $0x36c] ss:$16 sps:$4 sm:$0xff]  }
  0x44   :  { %1634 = vmatpush1.bf16.msra.mxu0 %v2734_v52  ;;  %1798 = vmatpush1.bf16.msra.mxu1 %v2735_v53  ;;  %v2820_v52 = vld [vmem:[#allocation2 + $0x360] ss:$16 sps:$4 sm:$0xff]   ;;  %v2823_v53 = vld [vmem:[#allocation2 + $0x368] ss:$16 sps:$4 sm:$0xff]  }
  0x45   :  { %1635 = vmatprep.subr.bf16.mxu0 %v2736_v54  ;;  %1799 = vmatprep.subr.bf16.mxu1 %v2738_v55  ;;  %v2828_v54 = vld [vmem:[#allocation2 + $0x384] ss:$16 sps:$4 sm:$0xff]   ;;  %v2831_v55 = vld [vmem:[#allocation2 + $0x38c] ss:$16 sps:$4 sm:$0xff]  }
  0x48   :  { %1636 = vmatpush1.bf16.msra.mxu0 %v2740_v56  ;;  %1800 = vmatpush1.bf16.msra.mxu1 %v2741_v57  ;;  %v2826_v56 = vld [vmem:[#allocation2 + $0x380] ss:$16 sps:$4 sm:$0xff]   ;;  %v2829_v57 = vld [vmem:[#allocation2 + $0x388] ss:$16 sps:$4 sm:$0xff]  }
  0x49   :  { %1637 = vmatprep.subr.bf16.mxu0 %v2742_v58  ;;  %1801 = vmatprep.subr.bf16.mxu1 %v2744_v59  ;;  %v2834_v58 = vld [vmem:[#allocation2 + $0x3a4] ss:$16 sps:$4 sm:$0xff]   ;;  %v2837_v59 = vld [vmem:[#allocation2 + $0x3ac] ss:$16 sps:$4 sm:$0xff]  }
  0x4c   :  { %1638 = vmatpush1.bf16.msra.mxu0 %v2746_v60  ;;  %1802 = vmatpush1.bf16.msra.mxu1 %v2747_v61  ;;  %v2832_v60 = vld [vmem:[#allocation2 + $0x3a0] ss:$16 sps:$4 sm:$0xff]   ;;  %v2835_v61 = vld [vmem:[#allocation2 + $0x3a8] ss:$16 sps:$4 sm:$0xff]  }
  0x4d   :  { %1639 = vmatprep.subr.bf16.mxu0 %v2748_v62  ;;  %1803 = vmatprep.subr.bf16.mxu1 %v2750_v63  ;;  %v2840_v62 = vld [vmem:[#allocation2 + $0x3c4] ss:$16 sps:$4 sm:$0xff]   ;;  %v2843_v63 = vld [vmem:[#allocation2 + $0x3cc] ss:$16 sps:$4 sm:$0xff]  }
  0x50   :  { %1640 = vmatpush1.bf16.msra.mxu0 %v2752_v0  ;;  %1804 = vmatpush1.bf16.msra.mxu1 %v2753_v1  ;;  %v2838_v0 = vld [vmem:[#allocation2 + $0x3c0] ss:$16 sps:$4 sm:$0xff]   ;;  %v2841_v1 = vld [vmem:[#allocation2 + $0x3c8] ss:$16 sps:$4 sm:$0xff]  }
  0x51   :  { %1650 = vmatprep.subr.bf16.mxu0 %v2756_v3  ;;  %1814 = vmatprep.subr.bf16.mxu1 %v2759_v4  ;;  %v2849_v3 = vld [vmem:[#allocation2 + $0x3ec] ss:$16 sps:$4 sm:$0xff]   ;;  %v2844_v4 = vld [vmem:[#allocation2 + $0x3e0] ss:$16 sps:$4 sm:$0xff]  }
  0x53   :  { %1642 = vmatmul.mubr.bf16.vlgmr.msra.gmra.mrb[0].mxu0 %v43_v5  ;;  %1806 = vmatmul.mubr.bf16.vlgmr.msra.gmra.mrb[0].mxu1 %v43_v5  ;;  %v2847_v5 = vld [vmem:[#allocation2 + $0x3e8] ss:$16 sps:$4 sm:$0xff]  }
  0x54   :  { %1651 = vmatpush1.bf16.msra.mxu0 %v2754_v6  ;;  %1815 = vmatpush1.bf16.msra.mxu1 %v2757_v7  ;;  %v2852_v6 = vld [vmem:[#allocation2 + $0x404] ss:$16 sps:$4 sm:$0xff]  }
  0x55   :  { %1652 = vmatprep.subr.bf16.mxu0 %v2762_v8  ;;  %1816 = vmatprep.subr.bf16.mxu1 %v2765_v9  ;;  %v37_v7 = vld [vmem:[%s3272_s0 + $0x10] sm:$0xff]  ;;  %v2855_v8 = vld [vmem:[#allocation2 + $0x40c] ss:$16 sps:$4 sm:$0xff]  }
  0x56   :  { %1682 = vmatprep.mubr.bf16.mxu0 %v46_v32  ;;  %1846 = vmatprep.mubr.bf16.mxu1 %v46_v32  ;;  %v2850_v9 = vld [vmem:[#allocation2 + $0x400] ss:$16 sps:$4 sm:$0xff]  }
  0x57   :  { %v2880_v32 = vld [vmem:[#allocation2 + $0x4a0] ss:$16 sps:$4 sm:$0xff]  }
  0x58   :  { %1653 = vmatpush1.bf16.msra.mxu0 %v2760_v10  ;;  %1817 = vmatpush1.bf16.msra.mxu1 %v2763_v11  ;;  %v2853_v10 = vld [vmem:[#allocation2 + $0x408] ss:$16 sps:$4 sm:$0xff]   ;;  %v45_v11 = vpack.c.bf16 %v37_v7, %v37_v7  ;;  %v2945_v7 = vld [vmem:[#allocation2 + $0x5ec] ss:$16 sps:$4 sm:$0xff]  }
  0x59   :  { %1654 = vmatprep.subr.bf16.mxu0 %v2768_v12  ;;  %1818 = vmatprep.subr.bf16.mxu1 %v2771_v13  ;;  %v2858_v12 = vld [vmem:[#allocation2 + $0x424] ss:$16 sps:$4 sm:$0xff]   ;;  %v2861_v13 = vld [vmem:[#allocation2 + $0x42c] ss:$16 sps:$4 sm:$0xff]  }
  0x5c   :  { %1655 = vmatpush1.bf16.msra.mxu0 %v2766_v14  ;;  %1819 = vmatpush1.bf16.msra.mxu1 %v2769_v15  ;;  %v40_v14 = vld [vmem:[%s3272_s0 + $0x28] sm:$0xff] }
  0x5d   :  { %1656 = vmatprep.subr.bf16.mxu0 %v2774_v16  ;;  %1820 = vmatprep.subr.bf16.mxu1 %v2777_v17  ;;  %v48_v15 = vpack.c.bf16 %v40_v14, %v40_v14  ;;  %v2856_v16 = vld [vmem:[#allocation2 + $0x420] ss:$16 sps:$4 sm:$0xff]   ;;  %v2859_v17 = vld [vmem:[#allocation2 + $0x428] ss:$16 sps:$4 sm:$0xff]  }
  0x5e   :  { %v2949_v14 = vld [vmem:[#allocation2 + $0x608] ss:$16 sps:$4 sm:$0xff]  }
  0x60   :  { %1657 = vmatpush1.bf16.msra.mxu0 %v2772_v18  ;;  %1821 = vmatpush1.bf16.msra.mxu1 %v2775_v19  ;;  %v2864_v18 = vld [vmem:[#allocation2 + $0x444] ss:$16 sps:$4 sm:$0xff]   ;;  %v2867_v19 = vld [vmem:[#allocation2 + $0x44c] ss:$16 sps:$4 sm:$0xff]  }
  0x61   :  { %1658 = vmatprep.subr.bf16.mxu0 %v2780_v20  ;;  %1822 = vmatprep.subr.bf16.mxu1 %v2783_v21  ;;  %v2862_v20 = vld [vmem:[#allocation2 + $0x440] ss:$16 sps:$4 sm:$0xff]   ;;  %v2865_v21 = vld [vmem:[#allocation2 + $0x448] ss:$16 sps:$4 sm:$0xff]  }
  0x64   :  { %1659 = vmatpush1.bf16.msra.mxu0 %v2778_v22  ;;  %1823 = vmatpush1.bf16.msra.mxu1 %v2781_v23  ;;  %v2870_v22 = vld [vmem:[#allocation2 + $0x464] ss:$16 sps:$4 sm:$0xff]   ;;  %v2873_v23 = vld [vmem:[#allocation2 + $0x46c] ss:$16 sps:$4 sm:$0xff]  }
  0x65   :  { %1660 = vmatprep.subr.bf16.mxu0 %v2786_v24  ;;  %1824 = vmatprep.subr.bf16.mxu1 %v2789_v25  ;;  %v2868_v24 = vld [vmem:[#allocation2 + $0x460] ss:$16 sps:$4 sm:$0xff]   ;;  %v2871_v25 = vld [vmem:[#allocation2 + $0x468] ss:$16 sps:$4 sm:$0xff]  }
  0x68   :  { %1661 = vmatpush1.bf16.msra.mxu0 %v2784_v26  ;;  %1825 = vmatpush1.bf16.msra.mxu1 %v2787_v27  ;;  %v2876_v26 = vld [vmem:[#allocation2 + $0x484] ss:$16 sps:$4 sm:$0xff]   ;;  %v2879_v27 = vld [vmem:[#allocation2 + $0x48c] ss:$16 sps:$4 sm:$0xff]  }
  0x69   :  { %1662 = vmatprep.subr.bf16.mxu0 %v2792_v28  ;;  %1826 = vmatprep.subr.bf16.mxu1 %v2795_v29  ;;  %v2874_v28 = vld [vmem:[#allocation2 + $0x480] ss:$16 sps:$4 sm:$0xff]   ;;  %v2877_v29 = vld [vmem:[#allocation2 + $0x488] ss:$16 sps:$4 sm:$0xff]  }
  0x6c   :  { %1663 = vmatpush1.bf16.msra.mxu0 %v2790_v31  ;;  %1827 = vmatpush1.bf16.msra.mxu1 %v2793_v33  ;;  %v2885_v31 = vld [vmem:[#allocation2 + $0x4ac] ss:$16 sps:$4 sm:$0xff]   ;;  %v2883_v33 = vld [vmem:[#allocation2 + $0x4a8] ss:$16 sps:$4 sm:$0xff]  }
  0x6d   :  { %1664 = vmatprep.subr.bf16.mxu0 %v2798_v34  ;;  %1828 = vmatprep.subr.bf16.mxu1 %v2801_v35  ;;  %v2888_v34 = vld [vmem:[#allocation2 + $0x4c4] ss:$16 sps:$4 sm:$0xff]   ;;  %v2891_v35 = vld [vmem:[#allocation2 + $0x4cc] ss:$16 sps:$4 sm:$0xff]  }
  0x70   :  { %1665 = vmatpush1.bf16.msra.mxu0 %v2796_v36  ;;  %1829 = vmatpush1.bf16.msra.mxu1 %v2799_v37  ;;  %v2886_v36 = vld [vmem:[#allocation2 + $0x4c0] ss:$16 sps:$4 sm:$0xff]   ;;  %v2889_v37 = vld [vmem:[#allocation2 + $0x4c8] ss:$16 sps:$4 sm:$0xff]  }
  0x71   :  { %1666 = vmatprep.subr.bf16.mxu0 %v2804_v38  ;;  %1830 = vmatprep.subr.bf16.mxu1 %v2807_v39  ;;  %v2894_v38 = vld [vmem:[#allocation2 + $0x4e4] ss:$16 sps:$4 sm:$0xff]   ;;  %v2897_v39 = vld [vmem:[#allocation2 + $0x4ec] ss:$16 sps:$4 sm:$0xff]  }
  0x74   :  { %1667 = vmatpush1.bf16.msra.mxu0 %v2802_v40  ;;  %1831 = vmatpush1.bf16.msra.mxu1 %v2805_v41  ;;  %v2892_v40 = vld [vmem:[#allocation2 + $0x4e0] ss:$16 sps:$4 sm:$0xff]   ;;  %v2895_v41 = vld [vmem:[#allocation2 + $0x4e8] ss:$16 sps:$4 sm:$0xff]  }
  0x75   :  { %1668 = vmatprep.subr.bf16.mxu0 %v2810_v42  ;;  %1832 = vmatprep.subr.bf16.mxu1 %v2813_v43  ;;  %v2900_v42 = vld [vmem:[#allocation2 + $0x504] ss:$16 sps:$4 sm:$0xff]   ;;  %v2903_v43 = vld [vmem:[#allocation2 + $0x50c] ss:$16 sps:$4 sm:$0xff]  }
  0x78   :  { %1669 = vmatpush1.bf16.msra.mxu0 %v2808_v44  ;;  %1833 = vmatpush1.bf16.msra.mxu1 %v2811_v45  ;;  %v2898_v44 = vld [vmem:[#allocation2 + $0x500] ss:$16 sps:$4 sm:$0xff]   ;;  %v2901_v45 = vld [vmem:[#allocation2 + $0x508] ss:$16 sps:$4 sm:$0xff]  }
  0x79   :  { %1670 = vmatprep.subr.bf16.mxu0 %v2816_v46  ;;  %1834 = vmatprep.subr.bf16.mxu1 %v2819_v47  ;;  %v2906_v46 = vld [vmem:[#allocation2 + $0x524] ss:$16 sps:$4 sm:$0xff]   ;;  %v2909_v47 = vld [vmem:[#allocation2 + $0x52c] ss:$16 sps:$4 sm:$0xff]  }
  0x7c   :  { %1671 = vmatpush1.bf16.msra.mxu0 %v2814_v48  ;;  %1835 = vmatpush1.bf16.msra.mxu1 %v2817_v49  ;;  %v2904_v48 = vld [vmem:[#allocation2 + $0x520] ss:$16 sps:$4 sm:$0xff]   ;;  %v2907_v49 = vld [vmem:[#allocation2 + $0x528] ss:$16 sps:$4 sm:$0xff]  }
  0x7d   :  { %1672 = vmatprep.subr.bf16.mxu0 %v2822_v50  ;;  %1836 = vmatprep.subr.bf16.mxu1 %v2825_v51  ;;  %v2912_v50 = vld [vmem:[#allocation2 + $0x544] ss:$16 sps:$4 sm:$0xff]   ;;  %v2915_v51 = vld [vmem:[#allocation2 + $0x54c] ss:$16 sps:$4 sm:$0xff]  }
  0x80   :  { %1673 = vmatpush1.bf16.msra.mxu0 %v2820_v52  ;;  %1837 = vmatpush1.bf16.msra.mxu1 %v2823_v53  ;;  %v2910_v52 = vld [vmem:[#allocation2 + $0x540] ss:$16 sps:$4 sm:$0xff]   ;;  %v2913_v53 = vld [vmem:[#allocation2 + $0x548] ss:$16 sps:$4 sm:$0xff]  }
  0x81   :  { %1674 = vmatprep.subr.bf16.mxu0 %v2828_v54  ;;  %1838 = vmatprep.subr.bf16.mxu1 %v2831_v55  ;;  %v2918_v54 = vld [vmem:[#allocation2 + $0x564] ss:$16 sps:$4 sm:$0xff]   ;;  %v2921_v55 = vld [vmem:[#allocation2 + $0x56c] ss:$16 sps:$4 sm:$0xff]  }
  0x84   :  { %1675 = vmatpush1.bf16.msra.mxu0 %v2826_v56  ;;  %1839 = vmatpush1.bf16.msra.mxu1 %v2829_v57  ;;  %v2916_v56 = vld [vmem:[#allocation2 + $0x560] ss:$16 sps:$4 sm:$0xff]   ;;  %v2919_v57 = vld [vmem:[#allocation2 + $0x568] ss:$16 sps:$4 sm:$0xff]  }
  0x85   :  { %1676 = vmatprep.subr.bf16.mxu0 %v2834_v58  ;;  %1840 = vmatprep.subr.bf16.mxu1 %v2837_v59  ;;  %v2924_v58 = vld [vmem:[#allocation2 + $0x584] ss:$16 sps:$4 sm:$0xff]   ;;  %v2927_v59 = vld [vmem:[#allocation2 + $0x58c] ss:$16 sps:$4 sm:$0xff]  }
  0x88   :  { %1677 = vmatpush1.bf16.msra.mxu0 %v2832_v60  ;;  %1841 = vmatpush1.bf16.msra.mxu1 %v2835_v61  ;;  %v2922_v60 = vld [vmem:[#allocation2 + $0x580] ss:$16 sps:$4 sm:$0xff]   ;;  %v2925_v61 = vld [vmem:[#allocation2 + $0x588] ss:$16 sps:$4 sm:$0xff]  }
  0x89   :  { %1678 = vmatprep.subr.bf16.mxu0 %v2840_v62  ;;  %1842 = vmatprep.subr.bf16.mxu1 %v2843_v63  ;;  %v2930_v62 = vld [vmem:[#allocation2 + $0x5a4] ss:$16 sps:$4 sm:$0xff]   ;;  %v2933_v63 = vld [vmem:[#allocation2 + $0x5ac] ss:$16 sps:$4 sm:$0xff]  }
  0x8c   :  { %1679 = vmatpush1.bf16.msra.mxu0 %v2838_v0  ;;  %1843 = vmatpush1.bf16.msra.mxu1 %v2841_v1  ;;  %v2928_v0 = vld [vmem:[#allocation2 + $0x5a0] ss:$16 sps:$4 sm:$0xff]   ;;  %v2931_v1 = vld [vmem:[#allocation2 + $0x5a8] ss:$16 sps:$4 sm:$0xff]  }
  0x8d   :  { %1680 = vmatprep.subr.bf16.mxu0 %v2846_v2  ;;  %1844 = vmatprep.subr.bf16.mxu1 %v2849_v3  ;;  %v2936_v2 = vld [vmem:[#allocation2 + $0x5c4] ss:$16 sps:$4 sm:$0xff]   ;;  %v2939_v3 = vld [vmem:[#allocation2 + $0x5cc] ss:$16 sps:$4 sm:$0xff]  }
  0x90   :  { %1681 = vmatpush1.bf16.msra.mxu0 %v2844_v4  ;;  %1845 = vmatpush1.bf16.msra.mxu1 %v2847_v5  ;;  %v2934_v4 = vld [vmem:[#allocation2 + $0x5c0] ss:$16 sps:$4 sm:$0xff]   ;;  %v2937_v5 = vld [vmem:[#allocation2 + $0x5c8] ss:$16 sps:$4 sm:$0xff]  }
  0x91   :  { %1691 = vmatprep.subr.bf16.mxu0 %v2852_v6  ;;  %1855 = vmatprep.subr.bf16.mxu1 %v2855_v8  ;;  %v2942_v6 = vld [vmem:[#allocation2 + $0x5e4] ss:$16 sps:$4 sm:$0xff]   ;;  %v2940_v8 = vld [vmem:[#allocation2 + $0x5e0] ss:$16 sps:$4 sm:$0xff]  }
  0x93   :  { %1683 = vmatmul.mubr.bf16.vlgmr.msra.gmra.mrb[0].mxu0 %v45_v11  ;;  %1847 = vmatmul.mubr.bf16.vlgmr.msra.gmra.mrb[0].mxu1 %v45_v11  ;;  %v39_v11 = vld [vmem:[%s3272_s0 + $0x20] sm:$0xff] }
  0x94   :  { %1692 = vmatpush1.bf16.msra.mxu0 %v2850_v9  ;;  %1856 = vmatpush1.bf16.msra.mxu1 %v2853_v10  ;;  %v2943_v9 = vld [vmem:[#allocation2 + $0x5e8] ss:$16 sps:$4 sm:$0xff]   ;;  %v2948_v10 = vld [vmem:[#allocation2 + $0x604] ss:$16 sps:$4 sm:$0xff]  }
  0x95   :  { %1693 = vmatprep.subr.bf16.mxu0 %v2858_v12  ;;  %1857 = vmatprep.subr.bf16.mxu1 %v2861_v13  ;;  %v2951_v12 = vld [vmem:[#allocation2 + $0x60c] ss:$16 sps:$4 sm:$0xff]   ;;  %v2946_v13 = vld [vmem:[#allocation2 + $0x600] ss:$16 sps:$4 sm:$0xff]  }
  0x96   :  { %1723 = vmatprep.mubr.bf16.mxu0 %v48_v15  ;;  %1887 = vmatprep.mubr.bf16.mxu1 %v48_v15  ;;  %v47_v15 = vpack.c.bf16 %v39_v11, %v39_v11  ;;  %v3041_v11 = vld [vmem:[#allocation2 + $0x7ec] ss:$16 sps:$4 sm:$0xff]  }
  0x98   :  { %1694 = vmatpush1.bf16.msra.mxu0 %v2856_v16  ;;  %1858 = vmatpush1.bf16.msra.mxu1 %v2859_v17  ;;  %v42_v16 = vld [vmem:[%s3272_s0 + $0x38] sm:$0xff]  ;;  %v2954_v17 = vld [vmem:[#allocation2 + $0x624] ss:$16 sps:$4 sm:$0xff]  }
  0x99   :  { %1695 = vmatprep.subr.bf16.mxu0 %v2864_v18  ;;  %1859 = vmatprep.subr.bf16.mxu1 %v2867_v19  ;;  %v2957_v18 = vld [vmem:[#allocation2 + $0x62c] ss:$16 sps:$4 sm:$0xff]   ;;  %v50_v19 = vpack.c.bf16 %v42_v16, %v42_v16  ;;  %v3043_v16 = vld [vmem:[%s3275_s3 + $0xc0] sm:$0xff]  }
  0x9c   :  { %1696 = vmatpush1.bf16.msra.mxu0 %v2862_v20  ;;  %1860 = vmatpush1.bf16.msra.mxu1 %v2865_v21  ;;  %v2952_v20 = vld [vmem:[#allocation2 + $0x620] ss:$16 sps:$4 sm:$0xff]   ;;  %v2955_v21 = vld [vmem:[#allocation2 + $0x628] ss:$16 sps:$4 sm:$0xff]  }
  0x9d   :  { %1697 = vmatprep.subr.bf16.mxu0 %v2870_v22  ;;  %1861 = vmatprep.subr.bf16.mxu1 %v2873_v23  ;;  %v2960_v22 = vld [vmem:[#allocation2 + $0x644] ss:$16 sps:$4 sm:$0xff]   ;;  %v2963_v23 = vld [vmem:[#allocation2 + $0x64c] ss:$16 sps:$4 sm:$0xff]  }
  0xa0   :  { %1698 = vmatpush1.bf16.msra.mxu0 %v2868_v24  ;;  %1862 = vmatpush1.bf16.msra.mxu1 %v2871_v25  ;;  %v2958_v24 = vld [vmem:[#allocation2 + $0x640] ss:$16 sps:$4 sm:$0xff]   ;;  %v2961_v25 = vld [vmem:[#allocation2 + $0x648] ss:$16 sps:$4 sm:$0xff]  }
  0xa1   :  { %1699 = vmatprep.subr.bf16.mxu0 %v2876_v26  ;;  %1863 = vmatprep.subr.bf16.mxu1 %v2879_v27  ;;  %v2966_v26 = vld [vmem:[#allocation2 + $0x664] ss:$16 sps:$4 sm:$0xff]   ;;  %v2969_v27 = vld [vmem:[#allocation2 + $0x66c] ss:$16 sps:$4 sm:$0xff]  }
  0xa4   :  { %1700 = vmatpush1.bf16.msra.mxu0 %v2874_v28  ;;  %1864 = vmatpush1.bf16.msra.mxu1 %v2877_v29  ;;  %v2964_v28 = vld [vmem:[#allocation2 + $0x660] ss:$16 sps:$4 sm:$0xff]   ;;  %v2967_v29 = vld [vmem:[#allocation2 + $0x668] ss:$16 sps:$4 sm:$0xff]  }
  0xa5   :  { %1701 = vmatprep.subr.bf16.mxu0 %v2882_v30  ;;  %1865 = vmatprep.subr.bf16.mxu1 %v2885_v31  ;;  %v2972_v30 = vld [vmem:[#allocation2 + $0x684] ss:$16 sps:$4 sm:$0xff]   ;;  %v2975_v31 = vld [vmem:[#allocation2 + $0x68c] ss:$16 sps:$4 sm:$0xff]  }
  0xa8   :  { %1702 = vmatpush1.bf16.msra.mxu0 %v2880_v32  ;;  %1866 = vmatpush1.bf16.msra.mxu1 %v2883_v33  ;;  %v2970_v32 = vld [vmem:[#allocation2 + $0x680] ss:$16 sps:$4 sm:$0xff]   ;;  %v2973_v33 = vld [vmem:[#allocation2 + $0x688] ss:$16 sps:$4 sm:$0xff]  }
  0xa9   :  { %1703 = vmatprep.subr.bf16.mxu0 %v2888_v34  ;;  %1867 = vmatprep.subr.bf16.mxu1 %v2891_v35  ;;  %v2978_v34 = vld [vmem:[#allocation2 + $0x6a4] ss:$16 sps:$4 sm:$0xff]   ;;  %v2981_v35 = vld [vmem:[#allocation2 + $0x6ac] ss:$16 sps:$4 sm:$0xff]  }
  0xac   :  { %1704 = vmatpush1.bf16.msra.mxu0 %v2886_v36  ;;  %1868 = vmatpush1.bf16.msra.mxu1 %v2889_v37  ;;  %v2976_v36 = vld [vmem:[#allocation2 + $0x6a0] ss:$16 sps:$4 sm:$0xff]   ;;  %v2979_v37 = vld [vmem:[#allocation2 + $0x6a8] ss:$16 sps:$4 sm:$0xff]  }
  0xad   :  { %1705 = vmatprep.subr.bf16.mxu0 %v2894_v38  ;;  %1869 = vmatprep.subr.bf16.mxu1 %v2897_v39  ;;  %v2984_v38 = vld [vmem:[#allocation2 + $0x6c4] ss:$16 sps:$4 sm:$0xff]   ;;  %v2987_v39 = vld [vmem:[#allocation2 + $0x6cc] ss:$16 sps:$4 sm:$0xff]  }
  0xb0   :  { %1706 = vmatpush1.bf16.msra.mxu0 %v2892_v40  ;;  %1870 = vmatpush1.bf16.msra.mxu1 %v2895_v41  ;;  %v2982_v40 = vld [vmem:[#allocation2 + $0x6c0] ss:$16 sps:$4 sm:$0xff]   ;;  %v2985_v41 = vld [vmem:[#allocation2 + $0x6c8] ss:$16 sps:$4 sm:$0xff]  }
  0xb1   :  { %1707 = vmatprep.subr.bf16.mxu0 %v2900_v42  ;;  %1871 = vmatprep.subr.bf16.mxu1 %v2903_v43  ;;  %v2990_v42 = vld [vmem:[#allocation2 + $0x6e4] ss:$16 sps:$4 sm:$0xff]   ;;  %v2993_v43 = vld [vmem:[#allocation2 + $0x6ec] ss:$16 sps:$4 sm:$0xff]  }
  0xb4   :  { %1708 = vmatpush1.bf16.msra.mxu0 %v2898_v44  ;;  %1872 = vmatpush1.bf16.msra.mxu1 %v2901_v45  ;;  %v2988_v44 = vld [vmem:[#allocation2 + $0x6e0] ss:$16 sps:$4 sm:$0xff]   ;;  %v2991_v45 = vld [vmem:[#allocation2 + $0x6e8] ss:$16 sps:$4 sm:$0xff]  }
  0xb5   :  { %1709 = vmatprep.subr.bf16.mxu0 %v2906_v46  ;;  %1873 = vmatprep.subr.bf16.mxu1 %v2909_v47  ;;  %v2996_v46 = vld [vmem:[#allocation2 + $0x704] ss:$16 sps:$4 sm:$0xff]   ;;  %v2999_v47 = vld [vmem:[#allocation2 + $0x70c] ss:$16 sps:$4 sm:$0xff]  }
  0xb8   :  { %1710 = vmatpush1.bf16.msra.mxu0 %v2904_v48  ;;  %1874 = vmatpush1.bf16.msra.mxu1 %v2907_v49  ;;  %v2994_v48 = vld [vmem:[#allocation2 + $0x700] ss:$16 sps:$4 sm:$0xff]   ;;  %v2997_v49 = vld [vmem:[#allocation2 + $0x708] ss:$16 sps:$4 sm:$0xff]  }
  0xb9   :  { %1711 = vmatprep.subr.bf16.mxu0 %v2912_v50  ;;  %1875 = vmatprep.subr.bf16.mxu1 %v2915_v51  ;;  %v3002_v50 = vld [vmem:[#allocation2 + $0x724] ss:$16 sps:$4 sm:$0xff]   ;;  %v3005_v51 = vld [vmem:[#allocation2 + $0x72c] ss:$16 sps:$4 sm:$0xff]  }
  0xbc   :  { %1712 = vmatpush1.bf16.msra.mxu0 %v2910_v52  ;;  %1876 = vmatpush1.bf16.msra.mxu1 %v2913_v53  ;;  %v3000_v52 = vld [vmem:[#allocation2 + $0x720] ss:$16 sps:$4 sm:$0xff]   ;;  %v3003_v53 = vld [vmem:[#allocation2 + $0x728] ss:$16 sps:$4 sm:$0xff]  }
  0xbd   :  { %1713 = vmatprep.subr.bf16.mxu0 %v2918_v54  ;;  %1877 = vmatprep.subr.bf16.mxu1 %v2921_v55  ;;  %v3008_v54 = vld [vmem:[#allocation2 + $0x744] ss:$16 sps:$4 sm:$0xff]   ;;  %v3011_v55 = vld [vmem:[#allocation2 + $0x74c] ss:$16 sps:$4 sm:$0xff]  }
  0xc0   :  { %1714 = vmatpush1.bf16.msra.mxu0 %v2916_v56  ;;  %1878 = vmatpush1.bf16.msra.mxu1 %v2919_v57  ;;  %v3006_v56 = vld [vmem:[#allocation2 + $0x740] ss:$16 sps:$4 sm:$0xff]   ;;  %v3009_v57 = vld [vmem:[#allocation2 + $0x748] ss:$16 sps:$4 sm:$0xff]  }
  0xc1   :  { %1715 = vmatprep.subr.bf16.mxu0 %v2924_v58  ;;  %1879 = vmatprep.subr.bf16.mxu1 %v2927_v59  ;;  %v3014_v58 = vld [vmem:[#allocation2 + $0x764] ss:$16 sps:$4 sm:$0xff]   ;;  %v3017_v59 = vld [vmem:[#allocation2 + $0x76c] ss:$16 sps:$4 sm:$0xff]  }
  0xc4   :  { %1716 = vmatpush1.bf16.msra.mxu0 %v2922_v60  ;;  %1880 = vmatpush1.bf16.msra.mxu1 %v2925_v61  ;;  %v3012_v60 = vld [vmem:[#allocation2 + $0x760] ss:$16 sps:$4 sm:$0xff]   ;;  %v3015_v61 = vld [vmem:[#allocation2 + $0x768] ss:$16 sps:$4 sm:$0xff]  }
  0xc5   :  { %1717 = vmatprep.subr.bf16.mxu0 %v2930_v62  ;;  %1881 = vmatprep.subr.bf16.mxu1 %v2933_v63  ;;  %v3020_v62 = vld [vmem:[#allocation2 + $0x784] ss:$16 sps:$4 sm:$0xff]   ;;  %v3023_v63 = vld [vmem:[#allocation2 + $0x78c] ss:$16 sps:$4 sm:$0xff]  }
  0xc8   :  { %1718 = vmatpush1.bf16.msra.mxu0 %v2928_v0  ;;  %1882 = vmatpush1.bf16.msra.mxu1 %v2931_v1  ;;  %v3018_v0 = vld [vmem:[#allocation2 + $0x780] ss:$16 sps:$4 sm:$0xff]   ;;  %v3021_v1 = vld [vmem:[#allocation2 + $0x788] ss:$16 sps:$4 sm:$0xff]  }
  0xc9   :  { %1719 = vmatprep.subr.bf16.mxu0 %v2936_v2  ;;  %1883 = vmatprep.subr.bf16.mxu1 %v2939_v3  ;;  %v3026_v2 = vld [vmem:[#allocation2 + $0x7a4] ss:$16 sps:$4 sm:$0xff]   ;;  %v3029_v3 = vld [vmem:[#allocation2 + $0x7ac] ss:$16 sps:$4 sm:$0xff]  }
  0xcc   :  { %1720 = vmatpush1.bf16.msra.mxu0 %v2934_v4  ;;  %1884 = vmatpush1.bf16.msra.mxu1 %v2937_v5  ;;  %v3024_v4 = vld [vmem:[#allocation2 + $0x7a0] ss:$16 sps:$4 sm:$0xff]   ;;  %v3027_v5 = vld [vmem:[#allocation2 + $0x7a8] ss:$16 sps:$4 sm:$0xff]  }
  0xcd   :  { %1721 = vmatprep.subr.bf16.mxu0 %v2942_v6  ;;  %1885 = vmatprep.subr.bf16.mxu1 %v2945_v7  ;;  %v3032_v6 = vld [vmem:[#allocation2 + $0x7c4] ss:$16 sps:$4 sm:$0xff]   ;;  %v3035_v7 = vld [vmem:[#allocation2 + $0x7cc] ss:$16 sps:$4 sm:$0xff]  }
  0xd0   :  { %1722 = vmatpush1.bf16.msra.mxu0 %v2940_v8  ;;  %1886 = vmatpush1.bf16.msra.mxu1 %v2943_v9  ;;  %v3030_v8 = vld [vmem:[#allocation2 + $0x7c0] ss:$16 sps:$4 sm:$0xff]   ;;  %v3033_v9 = vld [vmem:[#allocation2 + $0x7c8] ss:$16 sps:$4 sm:$0xff]  }
  0xd1   :  { %1732 = vmatprep.subr.bf16.mxu0 %v2948_v10  ;;  %1896 = vmatprep.subr.bf16.mxu1 %v2951_v12  ;;  %v3038_v10 = vld [vmem:[#allocation2 + $0x7e4] ss:$16 sps:$4 sm:$0xff]   ;;  %v3036_v12 = vld [vmem:[#allocation2 + $0x7e0] ss:$16 sps:$4 sm:$0xff]  }
  0xd3   :  { %1724 = vmatmul.mubr.bf16.vlgmr.msra.gmra.mrb[0].mxu0 %v47_v15  ;;  %1888 = vmatmul.mubr.bf16.vlgmr.msra.gmra.mrb[0].mxu1 %v47_v15  ;;  %v3042_v15 = vld [vmem:[%s3275_s3 + $0x40] sm:$0xff]  }
  0xd4   :  { %1733 = vmatpush1.bf16.msra.mxu0 %v2946_v13  ;;  %1897 = vmatpush1.bf16.msra.mxu1 %v2949_v14  ;;  %v3039_v13 = vld [vmem:[#allocation2 + $0x7e8] ss:$16 sps:$4 sm:$0xff]   ;;  %v41_v14 = vld [vmem:[%s3272_s0 + $0x30] sm:$0xff] }
  0xd5   :  { %1734 = vmatprep.subr.bf16.mxu0 %v2954_v17  ;;  %1898 = vmatprep.subr.bf16.mxu1 %v2957_v18  ;;  %v49_v17 = vpack.c.bf16 %v41_v14, %v41_v14  ;;  %v3044_v18 = vld [vmem:[%s3275_s3] sm:$0xff]  }
  0xd6   :  { %1764 = vmatprep.mubr.bf16.mxu0 %v50_v19  ;;  %1928 = vmatprep.mubr.bf16.mxu1 %v50_v19  ;;  %v3045_v19 = vld [vmem:[%s3275_s3 + $0x80] sm:$0xff]  }
  0xd8   :  { %1735 = vmatpush1.bf16.msra.mxu0 %v2952_v20  ;;  %1899 = vmatpush1.bf16.msra.mxu1 %v2955_v21  ;;  %v3046_v20 = vld [vmem:[%s3275_s3 + $0x48] sm:$0xff]  }
  0xd9   :  { %1736 = vmatprep.subr.bf16.mxu0 %v2960_v22  ;;  %1900 = vmatprep.subr.bf16.mxu1 %v2963_v23  ;;  %v3047_v21 = vld [vmem:[%s3275_s3 + $0xc8] sm:$0xff]  }
  0xda   :  { %v3048_v22 = vld [vmem:[%s3275_s3 + $0x8] sm:$0xff]  }
  0xdb   :  { %v3049_v23 = vld [vmem:[%s3275_s3 + $0x88] sm:$0xff]  }
  0xdc   :  { %1737 = vmatpush1.bf16.msra.mxu0 %v2958_v24  ;;  %1901 = vmatpush1.bf16.msra.mxu1 %v2961_v25  ;;  %v3050_v24 = vld [vmem:[%s3275_s3 + $0x50] sm:$0xff]  }
  0xdd   :  { %1738 = vmatprep.subr.bf16.mxu0 %v2966_v26  ;;  %1902 = vmatprep.subr.bf16.mxu1 %v2969_v27  ;;  %v3051_v25 = vld [vmem:[%s3275_s3 + $0xd0] sm:$0xff]  }
  0xde   :  { %v3052_v26 = vld [vmem:[%s3275_s3 + $0x10] sm:$0xff]  }
  0xdf   :  { %v3053_v27 = vld [vmem:[%s3275_s3 + $0x90] sm:$0xff]  }
  0xe0   :  { %1739 = vmatpush1.bf16.msra.mxu0 %v2964_v28  ;;  %1903 = vmatpush1.bf16.msra.mxu1 %v2967_v29  ;;  %v3054_v28 = vld [vmem:[%s3275_s3 + $0x58] sm:$0xff]  }
  0xe1   :  { %1740 = vmatprep.subr.bf16.mxu0 %v2972_v30  ;;  %1904 = vmatprep.subr.bf16.mxu1 %v2975_v31  ;;  %v3055_v29 = vld [vmem:[%s3275_s3 + $0xd8] sm:$0xff]  }
  0xe2   :  { %v3056_v30 = vld [vmem:[%s3275_s3 + $0x18] sm:$0xff]  }
  0xe3   :  { %v3057_v31 = vld [vmem:[%s3275_s3 + $0x98] sm:$0xff]  }
  0xe4   :  { %1741 = vmatpush1.bf16.msra.mxu0 %v2970_v32  ;;  %1905 = vmatpush1.bf16.msra.mxu1 %v2973_v33  ;;  %v3058_v32 = vld [vmem:[%s3275_s3 + $0x60] sm:$0xff]  }
  0xe5   :  { %1742 = vmatprep.subr.bf16.mxu0 %v2978_v34  ;;  %1906 = vmatprep.subr.bf16.mxu1 %v2981_v35  ;;  %v3059_v33 = vld [vmem:[%s3275_s3 + $0xe0] sm:$0xff]  }
  0xe6   :  { %v3060_v34 = vld [vmem:[%s3275_s3 + $0x20] sm:$0xff]  }
  0xe7   :  { %v3061_v35 = vld [vmem:[%s3275_s3 + $0xa0] sm:$0xff]  }
  0xe8   :  { %1743 = vmatpush1.bf16.msra.mxu0 %v2976_v36  ;;  %1907 = vmatpush1.bf16.msra.mxu1 %v2979_v37  ;;  %v3062_v36 = vld [vmem:[%s3275_s3 + $0x68] sm:$0xff]  }
  0xe9   :  { %1744 = vmatprep.subr.bf16.mxu0 %v2984_v38  ;;  %1908 = vmatprep.subr.bf16.mxu1 %v2987_v39  ;;  %v3063_v37 = vld [vmem:[%s3275_s3 + $0xe8] sm:$0xff]  }
  0xea   :  { %v3064_v38 = vld [vmem:[%s3275_s3 + $0x28] sm:$0xff]  }
  0xeb   :  { %v3065_v39 = vld [vmem:[%s3275_s3 + $0xa8] sm:$0xff]  }
  0xec   :  { %1745 = vmatpush1.bf16.msra.mxu0 %v2982_v40  ;;  %1909 = vmatpush1.bf16.msra.mxu1 %v2985_v41  ;;  %v3066_v40 = vld [vmem:[%s3275_s3 + $0x70] sm:$0xff]  }
  0xed   :  { %1746 = vmatprep.subr.bf16.mxu0 %v2990_v42  ;;  %1910 = vmatprep.subr.bf16.mxu1 %v2993_v43  ;;  %v3067_v41 = vld [vmem:[%s3275_s3 + $0xf0] sm:$0xff]  }
  0xee   :  { %v3068_v42 = vld [vmem:[%s3275_s3 + $0x30] sm:$0xff]  }
  0xef   :  { %v3069_v43 = vld [vmem:[%s3275_s3 + $0xb0] sm:$0xff]  }
  0xf0   :  { %1747 = vmatpush1.bf16.msra.mxu0 %v2988_v44  ;;  %1911 = vmatpush1.bf16.msra.mxu1 %v2991_v45  ;;  %v3070_v44 = vld [vmem:[%s3275_s3 + $0x78] sm:$0xff]  }
  0xf1   :  { %1748 = vmatprep.subr.bf16.mxu0 %v2996_v46  ;;  %1912 = vmatprep.subr.bf16.mxu1 %v2999_v47  ;;  %v3071_v45 = vld [vmem:[%s3275_s3 + $0xf8] sm:$0xff]  }
  0xf2   :  { %v3072_v46 = vld [vmem:[%s3275_s3 + $0x38] sm:$0xff]  }
  0xf3   :  { %v3073_v47 = vld [vmem:[%s3275_s3 + $0xb8] sm:$0xff]  }
  0xf4   :  { %1749 = vmatpush1.bf16.msra.mxu0 %v2994_v48  ;;  %1913 = vmatpush1.bf16.msra.mxu1 %v2997_v49  ;;  %v309_v48 = vlaneseq }
  0xf5   :  { %1750 = vmatprep.subr.bf16.mxu0 %v3002_v50  ;;  %1914 = vmatprep.subr.bf16.mxu1 %v3005_v51 }
  0xf6   :  { %v310_v49 = vshrl.u32 %v309_v48, 7 }
  0xf8   :  { %1751 = vmatpush1.bf16.msra.mxu0 %v3000_v52  ;;  %1915 = vmatpush1.bf16.msra.mxu1 %v3003_v53  ;;  %v311_v50 = vsub.s32 0, %v310_v49  ;;  %v319_v51 = vsub.s32 2, %v310_v49  ;;  %v307_v52 = vld [vmem:[%s3274_s2] sm:$0xf]  ;;  %v315_v53 = vsub.s32 1, %v310_v49 }
  0xf9   :  { %1752 = vmatprep.subr.bf16.mxu0 %v3008_v54  ;;  %1916 = vmatprep.subr.bf16.mxu1 %v3011_v55  ;;  %v323_v54 = vsub.s32 3, %v310_v49 }
  0xfa   :  { %v312_v55 = vrot.slane %v307_v52, %v311_v50 }
  0xfc   :  { %1753 = vmatpush1.bf16.msra.mxu0 %v3006_v56  ;;  %1917 = vmatpush1.bf16.msra.mxu1 %v3009_v57  ;;  %v320_v56 = vrot.slane %v307_v52, %v319_v51  ;;  %v316_v57 = vrot.slane %v307_v52, %v315_v53 }
  0xfd   :  { %1754 = vmatprep.subr.bf16.mxu0 %v3014_v58  ;;  %1918 = vmatprep.subr.bf16.mxu1 %v3017_v59  ;;  %v324_v58 = vrot.slane %v307_v52, %v323_v54 }
 0x100   :  { %1755 = vmatpush1.bf16.msra.mxu0 %v3012_v60  ;;  %1919 = vmatpush1.bf16.msra.mxu1 %v3015_v61 }
 0x101   :  { %1756 = vmatprep.subr.bf16.mxu0 %v3020_v62  ;;  %1920 = vmatprep.subr.bf16.mxu1 %v3023_v63 }
 0x104   :  { %1757 = vmatpush1.bf16.msra.mxu0 %v3018_v0  ;;  %1921 = vmatpush1.bf16.msra.mxu1 %v3021_v1 }
 0x105   :  { %1758 = vmatprep.subr.bf16.mxu0 %v3026_v2  ;;  %1922 = vmatprep.subr.bf16.mxu1 %v3029_v3 }
 0x108   :  { %1759 = vmatpush1.bf16.msra.mxu0 %v3024_v4  ;;  %1923 = vmatpush1.bf16.msra.mxu1 %v3027_v5 }
 0x109   :  { %1760 = vmatprep.subr.bf16.mxu0 %v3032_v6  ;;  %1924 = vmatprep.subr.bf16.mxu1 %v3035_v7 }
 0x10c   :  { %1761 = vmatpush1.bf16.msra.mxu0 %v3030_v8  ;;  %1925 = vmatpush1.bf16.msra.mxu1 %v3033_v9 }
 0x10d   :  { %1762 = vmatprep.subr.bf16.mxu0 %v3038_v10  ;;  %1926 = vmatprep.subr.bf16.mxu1 %v3041_v11 }
 0x110   :  { %1763 = vmatpush1.bf16.msra.mxu0 %v3036_v12  ;;  %1927 = vmatpush1.bf16.msra.mxu1 %v3039_v13 }
 0x111   :  { %2583 = vmatprep.subr.bf16.mxu0 %v3042_v15  ;;  %2605 = vmatprep.subr.bf16.mxu1 %v3043_v16 }
 0x113   :  { %1765 = vmatmul.mubr.bf16.vlgmr.msra.gmra.mrb[0].mxu0 %v49_v17  ;;  %1929 = vmatmul.mubr.bf16.vlgmr.msra.gmra.mrb[0].mxu1 %v49_v17  ;;  %v2550_v17 = vld [vmem:[%s3276_s4] ss:$0 sm:$0xff] }
 0x114   :  { %2584 = vmatpush3.bf16.msra.mxu0 %v3044_v18  ;;  %2606 = vmatpush3.bf16.msra.mxu1 %v3045_v19 }
 0x115   :  { %2585 = vmatprep.subr.bf16.mxu0 %v3046_v20  ;;  %2607 = vmatprep.subr.bf16.mxu1 %v3047_v21 }
 0x118   :  { %2586 = vmatpush3.bf16.msra.mxu0 %v3048_v22  ;;  %2608 = vmatpush3.bf16.msra.mxu1 %v3049_v23 }
 0x119   :  { %2587 = vmatprep.subr.bf16.mxu0 %v3050_v24  ;;  %2609 = vmatprep.subr.bf16.mxu1 %v3051_v25 }
 0x11c   :  { %2588 = vmatpush3.bf16.msra.mxu0 %v3052_v26  ;;  %2610 = vmatpush3.bf16.msra.mxu1 %v3053_v27 }
 0x11d   :  { %2589 = vmatprep.subr.bf16.mxu0 %v3054_v28  ;;  %2611 = vmatprep.subr.bf16.mxu1 %v3055_v29 }
 0x120   :  { %2590 = vmatpush3.bf16.msra.mxu0 %v3056_v30  ;;  %2612 = vmatpush3.bf16.msra.mxu1 %v3057_v31 }
 0x121   :  { %2591 = vmatprep.subr.bf16.mxu0 %v3058_v32  ;;  %2613 = vmatprep.subr.bf16.mxu1 %v3059_v33 }
 0x124   :  { %2592 = vmatpush3.bf16.msra.mxu0 %v3060_v34  ;;  %2614 = vmatpush3.bf16.msra.mxu1 %v3061_v35 }
 0x125   :  { %2593 = vmatprep.subr.bf16.mxu0 %v3062_v36  ;;  %2615 = vmatprep.subr.bf16.mxu1 %v3063_v37 }
 0x128   :  { %2594 = vmatpush3.bf16.msra.mxu0 %v3064_v38  ;;  %2616 = vmatpush3.bf16.msra.mxu1 %v3065_v39 }
 0x129   :  { %2595 = vmatprep.subr.bf16.mxu0 %v3066_v40  ;;  %2617 = vmatprep.subr.bf16.mxu1 %v3067_v41 }
 0x12c   :  { %2596 = vmatpush3.bf16.msra.mxu0 %v3068_v42  ;;  %2618 = vmatpush3.bf16.msra.mxu1 %v3069_v43 }
 0x12d   :  { %2597 = vmatprep.subr.bf16.mxu0 %v3070_v44  ;;  %2619 = vmatprep.subr.bf16.mxu1 %v3071_v45 }
 0x130   :  { %2598 = vmatpush3.bf16.msra.mxu0 %v3072_v46  ;;  %2620 = vmatpush3.bf16.msra.mxu1 %v3073_v47 }
 0x1e6   :  { %v1766_v59 = vpop.f32.mrb[0].mxu0  ;;  %v1930_v60 = vpop.f32.mrb[0].mxu1 }
 0x1e7   :  { %v2627_v61 = vadd.f32 %v1766_v59, %v312_v55  ;;  %v2629_v62 = vadd.f32 %v1930_v60, %v320_v56  ;;  %v1768_v63 = vpop.f32.mrb[1].mxu0  ;;  %v1932_v0 = vpop.f32.mrb[1].mxu1 }
 0x1e8   :  { %v2628_v1 = vadd.f32 %v1768_v63, %v316_v57  ;;  %v2630_v2 = vadd.f32 %v1932_v0, %v324_v58  ;;  %v1770_v3 = vpop.f32.mrb[2].mxu0  ;;  %v1934_v4 = vpop.f32.mrb[2].mxu1 }
 0x1e9   :  { %v1937_v5 = vmax.f32 %v2627_v61, 0.0  ;;  %v1939_v6 = vmax.f32 %v2629_v62, 0.0  ;;  %v1771_v7 = vpop.f32.mrb[3].mxu0  ;;  %v1935_v8 = vpop.f32.mrb[3].mxu1 }
 0x1ea   :  { %v1938_v9 = vmax.f32 %v2628_v1, 0.0  ;;  %v1940_v10 = vmax.f32 %v2630_v2, 0.0 }
 0x1eb   :  { %v1941_v13 = vpack.c.bf16 %v1937_v5, %v1937_v5  ;;  %v1943_v14 = vpack.c.bf16 %v1939_v6, %v1939_v6 }
 0x1ec   :  { %v1942_v11 = vpack.c.bf16 %v1938_v9, %v1938_v9  ;;  %v1944_v12 = vpack.c.bf16 %v1940_v10, %v1940_v10 }
 0x1ee   :  { %2240 = vmatprep.mubr.bf16.mxu0 %v1942_v11  ;;  %2280 = vmatprep.mubr.bf16.mxu1 %v1944_v12 }
 0x1ef   :  { %2241 = vmatmul.mubr.bf16.vlgmr.msra.gmra.mrb[4].mxu0 %v1941_v13  ;;  %2281 = vmatmul.mubr.bf16.vlgmr.msra.gmra.mrb[4].mxu1 %v1943_v14 }
 0x2c2   :  { %v2599_v15 = vpop.f32.mrb[4].mxu0  ;;  %v2621_v16 = vpop.f32.mrb[4].mxu1 }
 0x2c3   :  { %v2600_v18 = vpop.f32.mrb[5].mxu0  ;;  %v2622_v19 = vpop.f32.mrb[5].mxu1 }
 0x2c4   :  { %v2601_v20 = vadd.f32 %v2600_v18, %v2599_v15  ;;  %v2623_v21 = vadd.f32 %v2622_v19, %v2621_v16  ;;  %v2602_v22 = vpop.f32.mrb[6].mxu0  ;;  %v2624_v23 = vpop.f32.mrb[6].mxu1 }
 0x2c5   :  { %v2603_v24 = vpop.f32.mrb[7].mxu0  ;;  %v2625_v25 = vpop.f32.mrb[7].mxu1 }
 0x2c6   :  { %v2243_v26 = vadd.f32 %v2601_v20, %v2550_v17 }
 0x2c8   :  { %v2283_v27 = vadd.f32 %v2623_v21, %v2243_v26 }
 0x2ca   :  { %2288 = vst [vmem:[%s3277_s5] sm:$0xff] %v2283_v27 }
 0x2cb   :  { %2293 = vsyncpa [#allocation3], 1 }

</bundles_post_ra>
